<compile_context>
chip_gen: v6e
topology: v6e:2x2x1
jax: 0.10.0
libtpu: 0.0.40
codegen_flags: <defaults>
</compile_context>

<pallas_src>
import jax
import jax.numpy as jnp
from jax.experimental import pallas as pl
from jax.experimental.pallas import tpu as pltpu


def _round_up(n, m):
    return ((n + m - 1) // m) * m


def _choose_tb(B):
    """Batch tile size.

    Small B: single full block (block dim == full array dim, so no (8,128)
    divisibility issue and a 1-step grid).  Large B: TB in [512, 4096],
    multiple of 512, targeting >= ~4 grid steps so the parallel batch axis
    actually shards across both v7x TensorCores.
    """
    if B <= 512:
        return B
    tb = _round_up(pl.cdiv(B, 4), 512)
    return max(512, min(4096, tb))


def _mlp_kernel_o1(x_ref, w1t_ref, b1_ref, w2_ref, b2_ref, o_ref):
    """n_output == 1 path (natural batch-major layout).

    x_ref  : (TB, F)   input tile (batch-major, pipelined over the grid)
    w1t_ref: (F, Hp)   transposed hidden weight, hidden dim padded to 128
    b1_ref : (1, Hp)   hidden bias (padded)
    w2_ref : (1, Hp)   predict weight row (padded)
    b2_ref : (1, 1)    predict bias, SMEM scalar
    o_ref  : (TB, 1)   output tile
    """
    # Hidden layer on the MXU: (TB, F) @ (F, Hp) -> (TB, Hp), f32 accumulation.
    h = jnp.dot(x_ref[...], w1t_ref[...], preferred_element_type=jnp.float32)
    h = jnp.maximum(h + b1_ref[...], 0.0)                    # VPU bias + relu
    # Degenerate 1-column second matmul: VPU multiply + XLU lane reduction
    # instead of an MXU push/drain.
    out = jnp.sum(h * w2_ref[...], axis=1, keepdims=True)    # (TB, 1)
    o_ref[...] = (out + b2_ref[0, 0]).astype(o_ref.dtype)


def _mlp_kernel_general(x_ref, w1t_ref, b1_ref, w2t_ref, b2_ref, o_ref):
    """General n_output > 1 fallback (same batch-major layout).

    w2t_ref: (Hp, O), b2_ref: (1, O), o_ref: (TB, O)
    """
    h = jnp.dot(x_ref[...], w1t_ref[...], preferred_element_type=jnp.float32)
    h = jnp.maximum(h + b1_ref[...], 0.0)
    out = jnp.dot(h, w2t_ref[...], preferred_element_type=jnp.float32)
    o_ref[...] = (out + b2_ref[...]).astype(o_ref.dtype)


def make_net_forward(w1, b1, w2, b2):
    """One-time param prep + jitted forward.

    w1: (H, F) torch-layout hidden weight (H = 100)
    b1: (H,)   hidden bias
    w2: (O, H) torch-layout predict weight
    b2: (O,)   predict bias
    Returns forward(x: (B, F) f32) -> (B, O) f32.
    """
    H, F = w1.shape
    O = w2.shape[0]
    # Pad hidden dim to one full 128 lane tile (exact: padded w1 rows give
    # relu(0 + 0) = 0 and meet zero predict weights).  Do NOT pad further.
    Hp = _round_up(H, 128)

    w1t_p = jnp.zeros((F, Hp), jnp.float32).at[:, :H].set(w1.T)
    b1_p = jnp.zeros((1, Hp), jnp.float32).at[0, :H].set(b1)

    if O == 1:
        kernel = _mlp_kernel_o1
        w2_p = jnp.zeros((1, Hp), jnp.float32).at[0, :H].set(w2[0])
        b2_p = b2.reshape(1, 1).astype(jnp.float32)          # SMEM scalar
    else:
        kernel = _mlp_kernel_general
        w2_p = jnp.zeros((Hp, O), jnp.float32).at[:H, :].set(w2.T)
        b2_p = b2.reshape(1, O).astype(jnp.float32)

    def forward(x):
        B = x.shape[0]
        TB = _choose_tb(B)
        grid = (pl.cdiv(B, TB),)

        flops = 2 * B * F * Hp + (3 * B * Hp if O == 1 else 2 * B * Hp * O)
        bytes_accessed = 4 * (B * F + w1t_p.size + b1_p.size
                              + w2_p.size + b2_p.size + B * O)

        in_specs = [
            pl.BlockSpec((TB, F), lambda i: (i, 0)),        # x tile, pipelined
            pl.BlockSpec((F, Hp), lambda i: (0, 0)),        # weights resident
            pl.BlockSpec((1, Hp), lambda i: (0, 0)),
            pl.BlockSpec(w2_p.shape, lambda i: (0, 0)),
        ]
        if O == 1:
            in_specs.append(
                pl.BlockSpec(memory_space=pltpu.MemorySpace.SMEM))  # b2 scalar
        else:
            in_specs.append(pl.BlockSpec((1, O), lambda i: (0, 0)))

        return pl.pallas_call(
            kernel,
            out_shape=jax.ShapeDtypeStruct((B, O), jnp.float32),
            grid=grid,
            in_specs=in_specs,
            out_specs=pl.BlockSpec((TB, O), lambda i: (i, 0)),
            compiler_params=pltpu.CompilerParams(
                dimension_semantics=("parallel",)),
            cost_estimate=pl.CostEstimate(
                flops=flops, transcendentals=0,
                bytes_accessed=bytes_accessed),
        )(x.astype(jnp.float32), w1t_p, b1_p, w2_p, b2_p)

    return jax.jit(forward)


def reference_forward(x, w1, b1, w2, b2):
    h = jnp.maximum(x @ w1.T + b1, 0.0)
    return h @ w2.T + b2


if __name__ == "__main__":
    # Module hyper-params (housing regression style): n_feature=13, n_output=1
    n_feature, n_hidden, n_output = 13, 100, 1
    batch = 8

    key = jax.random.PRNGKey(0)
    kx, kw1, kb1, kw2, kb2 = jax.random.split(key, 5)

    x = jax.random.normal(kx, (batch, n_feature), dtype=jnp.float32)
    # torch.nn.Linear stores W as (out, in); keep that layout here.
    w1 = jax.random.normal(kw1, (n_hidden, n_feature), dtype=jnp.float32) * 0.1
    b1 = jax.random.normal(kb1, (n_hidden,), dtype=jnp.float32) * 0.1
    w2 = jax.random.normal(kw2, (n_output, n_hidden), dtype=jnp.float32) * 0.1
    b2 = jax.random.normal(kb2, (n_output,), dtype=jnp.float32) * 0.1

    forward = make_net_forward(w1, b1, w2, b2)
    out = jax.block_until_ready(forward(x))
    ref = reference_forward(x, w1, b1, w2, b2)
    assert out.shape == (batch, n_output)
    assert jnp.allclose(out, ref, atol=1e-5, rtol=1e-5), float(
        jnp.max(jnp.abs(out - ref)))

    # Also exercise the general n_output > 1 fallback path.
    n_output2, batch2 = 3, 16
    kw2b, kb2b, kxb = jax.random.split(kb2, 3)
    x2 = jax.random.normal(kxb, (batch2, n_feature), dtype=jnp.float32)
    w2b = jax.random.normal(kw2b, (n_output2, n_hidden), dtype=jnp.float32) * 0.1
    b2b = jax.random.normal(kb2b, (n_output2,), dtype=jnp.float32) * 0.1
    forward2 = make_net_forward(w1, b1, w2b, b2b)
    out2 = jax.block_until_ready(forward2(x2))
    ref2 = reference_forward(x2, w1, b1, w2b, b2b)
    assert out2.shape == (batch2, n_output2)
    assert jnp.allclose(out2, ref2, atol=1e-5, rtol=1e-5), float(
        jnp.max(jnp.abs(out2 - ref2)))

    print("KERNEL_OK")
</pallas_src>

<mosaic_0001>
module attributes {stable_mosaic.version = 11 : i64} {
  func.func @_mlp_kernel_o1(%arg0: i32, %arg1: memref<8x13xf32, #tpu.memory_space<vmem>>, %arg2: memref<13x128xf32, #tpu.memory_space<vmem>>, %arg3: memref<1x128xf32, #tpu.memory_space<vmem>>, %arg4: memref<1x128xf32, #tpu.memory_space<vmem>>, %arg5: memref<1x1xf32, #tpu.memory_space<smem>>, %arg6: memref<8x1xf32, #tpu.memory_space<vmem>>) attributes {dimension_semantics = [#tpu.dimension_semantics<parallel>], iteration_bounds = array<i64: 1>, scalar_prefetch = 0 : i64, scratch_operands = 0 : i64, tpu.core_type = #tpu.core_type<tc>, window_params = [{transform_indices = @transform_0, window_bounds = array<i64: 8, 13>}, {pipeline_mode = #tpu.pipeline_mode<synchronous>, transform_indices = @transform_1, window_bounds = array<i64: 13, 128>}, {pipeline_mode = #tpu.pipeline_mode<synchronous>, transform_indices = @transform_2, window_bounds = array<i64: 1, 128>}, {pipeline_mode = #tpu.pipeline_mode<synchronous>, transform_indices = @transform_3, window_bounds = array<i64: 1, 128>}, {transform_indices = @transform_4, window_bounds = array<i64: 1, 1>}, {transform_indices = @transform_5, window_bounds = array<i64: 8, 1>}]} {
    %c0 = arith.constant 0 : index
    %c0_0 = arith.constant 0 : index
    %0 = vector.load %arg1[%c0, %c0_0] : memref<8x13xf32, #tpu.memory_space<vmem>>, vector<8x13xf32>
    %c0_1 = arith.constant 0 : index
    %c0_2 = arith.constant 0 : index
    %1 = vector.load %arg2[%c0_1, %c0_2] : memref<13x128xf32, #tpu.memory_space<vmem>>, vector<13x128xf32>
    %cst = arith.constant dense<0.000000e+00> : vector<8x128xf32>
    %2 = tpu.matmul %0, %1, %cst {dimension_numbers = #tpu.dot_dimension_numbers<[1], [0], [0], [1], [0, 0, 1, 1], [], []>} : vector<8x13xf32>, vector<13x128xf32>, vector<8x128xf32> -> vector<8x128xf32>
    %c0_3 = arith.constant 0 : index
    %c0_4 = arith.constant 0 : index
    %3 = vector.load %arg3[%c0_3, %c0_4] : memref<1x128xf32, #tpu.memory_space<vmem>>, vector<1x128xf32>
    %4 = vector.broadcast %3 : vector<1x128xf32> to vector<8x128xf32>
    %5 = arith.addf %2, %4 : vector<8x128xf32>
    %cst_5 = arith.constant 0.000000e+00 : f32
    %6 = vector.broadcast %cst_5 : f32 to vector<8x128xf32>
    %7 = arith.maximumf %5, %6 : vector<8x128xf32>
    %c0_6 = arith.constant 0 : index
    %c0_7 = arith.constant 0 : index
    %8 = vector.load %arg4[%c0_6, %c0_7] : memref<1x128xf32, #tpu.memory_space<vmem>>, vector<1x128xf32>
    %9 = vector.broadcast %8 : vector<1x128xf32> to vector<8x128xf32>
    %10 = arith.mulf %7, %9 : vector<8x128xf32>
    %cst_8 = arith.constant dense<0.000000e+00> : vector<8xf32>
    %11 = vector.multi_reduction <add>, %10, %cst_8 [1] : vector<8x128xf32> to vector<8xf32>
    %12 = vector.shape_cast %11 : vector<8xf32> to vector<8x1xf32>
    %c0_9 = arith.constant 0 : index
    %c0_10 = arith.constant 0 : index
    %13 = memref.load %arg5[%c0_9, %c0_10] : memref<1x1xf32, #tpu.memory_space<smem>>
    %14 = vector.broadcast %13 : f32 to vector<8x1xf32>
    %15 = arith.addf %12, %14 : vector<8x1xf32>
    %c0_11 = arith.constant 0 : index
    %c0_12 = arith.constant 0 : index
    %16 = vector.load %arg6[%c0_11, %c0_12] : memref<8x1xf32, #tpu.memory_space<vmem>>, vector<8x1xf32>
    tpu.vector_store %arg6[%c0_11, %c0_12], %15 {strides = array<i32>} : memref<8x1xf32, #tpu.memory_space<vmem>>, vector<8x1xf32>,
    return
  }
  func.func @transform_0(%arg0: i32) -> (i32, i32) {
    %c0_i32 = arith.constant 0 : i32
    %c0_i32_0 = arith.constant 0 : i32
    return %arg0, %c0_i32 : i32, i32
  }
  func.func @transform_1(%arg0: i32) -> (i32, i32) {
    %c0_i32 = arith.constant 0 : i32
    %c0_i32_0 = arith.constant 0 : i32
    %c0_i32_1 = arith.constant 0 : i32
    return %c0_i32, %c0_i32_0 : i32, i32
  }
  func.func @transform_2(%arg0: i32) -> (i32, i32) {
    %c0_i32 = arith.constant 0 : i32
    %c0_i32_0 = arith.constant 0 : i32
    %c0_i32_1 = arith.constant 0 : i32
    return %c0_i32, %c0_i32_0 : i32, i32
  }
  func.func @transform_3(%arg0: i32) -> (i32, i32) {
    %c0_i32 = arith.constant 0 : i32
    %c0_i32_0 = arith.constant 0 : i32
    %c0_i32_1 = arith.constant 0 : i32
    return %c0_i32, %c0_i32_0 : i32, i32
  }
  func.func @transform_4(%arg0: i32) -> (i32, i32) {
    %c0_i32 = arith.constant 0 : i32
    %c0_i32_0 = arith.constant 0 : i32
    %c0_i32_1 = arith.constant 0 : i32
    return %c0_i32, %c0_i32_0 : i32, i32
  }
  func.func @transform_5(%arg0: i32) -> (i32, i32) {
    %c0_i32 = arith.constant 0 : i32
    %c0_i32_0 = arith.constant 0 : i32
    return %arg0, %c0_i32 : i32, i32
  }
}

</mosaic_0001>

<bundles_post_ra>
// kernel: forward.1
= control target key start
LH: loop header
LB: loop body
LE: loop exit
PB: predicated region body
PF: predicated region fallthrough
CT: control target
= control target key end

     0   :  { %11 = vsyncpa [#allocation4], 0  ;;  %s275_s0 = inlined_call_operand.hbm [shape: f32[8,13], index: 0, kind: input, shape index: {}]   ;;  %s276_s1 = inlined_call_operand.hbm [shape: f32[13,128], index: 1, kind: input, shape index: {}]   ;;  %s277_s2 = inlined_call_operand.vmem [shape: f32[1,128], index: 2, kind: input, shape index: {}]   ;;  %s278_s3 = inlined_call_operand.vmem [shape: f32[1,128], index: 3, kind: input, shape index: {}]   ;;  %s279_s4 = inlined_call_operand.<no memory space> [shape: f32[1,1], index: 4, kind: input, shape index: {}]   ;;  %s280_s5 = inlined_call_operand.vmem [shape: f32[8,1], index: 5, kind: output, shape index: {}]  }
   0x1   :  { %12 = vsyncpa [#allocation6], 0  ;;  %s221_s18 = smov [#allocation3]   ;;  %s222_s20 = smov [#allocation5]  }
   0x2   :  { %s19_s19 = sshll.u32 %s221_s18, 4  ;;  %s28_s21 = sshll.u32 %s222_s20, 4  ;;  %s20_s19 = int_to_ptr.vmem [resolvable:$true] %s19_s19  ;;  %s29_s21 = int_to_ptr.vmem [resolvable:$true] %s28_s21 }
   0x3   :  { %s185_s22 = scalar_lea.vmem %s20_s19, 128  ;;  %p190_p1 = scmp.lt.s32.totalorder %s20_s19, %s20_s19 }
   0x4   :  { %p186_p0 = scmp.ne.s32.totalorder %s20_s19, %s185_s22  ;;  %p191_p2 = scmp.lt.s32.totalorder %s185_s22, %s185_s22 }
   0x6   :  { %p192_p3 = por %p191_p2, %p190_p1 }
   0x8   :  { %p193_p4 = pnand %p192_p3, %p186_p0 }
   0xa   :  { %196 = shalt.err (!%p193_p4)
}
   0xb   :  { %22 = dma.hbm_to_vmem [thread:$0]  %s275_s0, 128, %s20_s19, [#allocation4]  }
   0xc   :  { %s205_s25 = scalar_lea.vmem %s29_s21, 256  ;;  %p210_p6 = scmp.lt.s32.totalorder %s29_s21, %s29_s21 }
   0xd   :  { %p206_p5 = scmp.ne.s32.totalorder %s29_s21, %s205_s25  ;;  %p211_p7 = scmp.lt.s32.totalorder %s205_s25, %s205_s25 }
   0xf   :  { %p212_p8 = por %p211_p7, %p210_p6 }
  0x11   :  { %p213_p9 = pnand %p212_p8, %p206_p5 }
  0x13   :  { %216 = shalt.err (!%p213_p9)
}
  0x14   :  { %s223_s26 = smov 128   ;;  %s224_s27 = smov 8  }
  0x15   :  { %34 = dma.hbm_to_vmem [thread:$0]  %s276_s1, 256, %s29_s21, [#allocation6], %s223_s26, %s223_s26, %s224_s27  }
  0x16   :  { %217 = dma.done.wait [#allocation4], 128  }
  0x17   :  { %218 = vsyncadd [#allocation4], 4294967168 }
  0x18   :  { %219 = dma.done.wait [#allocation6], 256  }
  0x19   :  { %220 = vsyncadd [#allocation6], 4294967040  ;;  %v225_v0 = vmov 0.0   ;;  %vm226_vm0 = vmmov 0   ;;  %vm61_vm1 = vcmask 1044480   ;;  %v48_v2 = vld [vmem:[#allocation5] sm:$0xff]  ;;  %v147_v11 = vstv %s279_s4 }
  0x1a   :  { %164 = vmatprep.subr.mxu0 %v225_v0  ;;  %168 = vmatprep.mubr.msk.f32.mxu0 %vm226_vm0, %v225_v0  ;;  %v49_v1 = vld [vmem:[#allocation5 + $0x8] sm:$0x1f]  ;;  %v47_v3 = vld [vmem:[#allocation3] sm:$0xff]  ;;  %vm57_vm2 = vcmask 105472   ;;  %vm149_vm3 = vcmask 7168  }
  0x1b   :  { %165 = vmatpush3.msk.msra.mxu0 %vm61_vm1, %v49_v1  ;;  %v157_v4 = vld [vmem:[%s277_s2] ss:$0 sm:$0xff] }
  0x1c   :  { %166 = vmatprep.subr.mxu0 %v225_v0  ;;  %v160_v8 = vld [vmem:[%s278_s3] ss:$0 sm:$0xff] }
  0x1d   :  { %167 = vmatpush3.msra.mxu0 %v48_v2 }
  0x1e   :  { %169 = vmatmul.mubr.msk.f32.vlgmr.msra.gmra.mxu0 %vm57_vm2, %v47_v3 }
  0xde   :  { %v131_v5 = vpop.f32.mrf.mxu0 }
  0xdf   :  { %v132_v6 = vadd.f32 %v157_v4, %v131_v5 }
  0xe0   :  { %v170_v7 = vpop.f32.mrf.mxu0 }
  0xe1   :  { %v135_v9 = vmax.f32 %v132_v6, 0.0 }
  0xe3   :  { %v143_v10 = vmul.f32 %v160_v8, %v135_v9 }
  0xe5   :  { %144 = vadd.xlane.f32.xlu0 %v143_v10 }
 0x16e   :  { %v145_v12 = vpop.xlane.xlu0 %144 }
 0x16f   :  { %v148_v13 = vadd.f32 %v147_v11, %v145_v12 }
 0x171   :  { %150 = vst.msk [vmem:[%s280_s5] sm:$0xff] %vm149_vm3, %v148_v13 }
 0x172   :  { %155 = vsyncpa [#allocation4], 1 }
 0x173   :  { %156 = vsyncpa [#allocation6], 1 }

</bundles_post_ra>
